<compile_context>
chip_gen: v6e
topology: v6e:2x2x1
jax: 0.10.0
libtpu: 0.0.40
codegen_flags: <defaults>
</compile_context>

<pallas_src>
import math
from functools import partial

import jax
import jax.numpy as jnp
from jax import lax
from jax.experimental import pallas as pl
from jax.experimental.pallas import tpu as pltpu


def _stats_kernel(x_ref, sum_ref, sq_ref, *, n_rows, need_mask):
    """Accumulate lane-wise sum and sum-of-squares across frame blocks.

    x_ref:   (nblk, CHW) block of the [N, C*H*W] input.
    sum_ref: (1, 1, CHW) per-core accumulator (constant index over the
    sq_ref:  (1, 1, CHW) "arbitrary" grid axis -> resident in VMEM).
    Rows >= n_rows (partial tail block / duplicated out-of-range block on the
    parallel axis) are masked to zero before accumulation.
    """
    s = pl.program_id(1)

    @pl.when(s == 0)
    def _():
        sum_ref[...] = jnp.zeros_like(sum_ref)
        sq_ref[...] = jnp.zeros_like(sq_ref)

    xb = x_ref[...].astype(jnp.float32)          # (nblk, CHW)
    if need_mask:
        nblk = x_ref.shape[0]
        blk = pl.program_id(0) * pl.num_programs(1) + s
        rows = blk * nblk + lax.broadcasted_iota(jnp.int32, (nblk, 1), 0)
        xb = jnp.where(rows < n_rows, xb, 0.0)

    # Pure VPU adds per step; the per-channel (lane-group) fold happens once
    # in the wrapper on a tiny (CHW,) vector, not every grid step.
    sum_ref[...] += jnp.sum(xb, axis=0, keepdims=True)[None]
    sq_ref[...] += jnp.sum(xb * xb, axis=0, keepdims=True)[None]


def _apply_kernel(x_ref, pcol_ref, a_ref, b_ref, o_ref):
    """Fused BN-normalize + affine + per-timestep scale.

    x_ref:    (nblk, CHW)
    pcol_ref: (nblk, 1)   p[t] pattern per row (block starts are multiples of T)
    a_ref:    (1, CHW)    gamma*inv_std expanded per lane
    b_ref:    (1, CHW)    beta - mean*gamma*inv_std expanded per lane
    """
    x = x_ref[...].astype(jnp.float32)
    y = (x * a_ref[...] + b_ref[...]) * pcol_ref[...]
    o_ref[...] = y.astype(o_ref.dtype)


def _lcm(a, b):
    return a * b // math.gcd(a, b)


def _pick_block_rows(n_rows, row_bytes, t, target_bytes):
    """Fixed-target block size (no divisor-of-N search).

    Multi-block case: rows is a multiple of lcm(8, T) so every block is
    (8,128)-legal and starts at a multiple of T.  If one block would cover the
    whole array, use a single full-extent block (always layout-legal).
    """
    align = _lcm(8, t)
    rows = max(1, target_bytes // max(1, row_bytes))
    rows = max(align, (rows // align) * align)
    if rows >= n_rows:
        return n_rows
    return rows


def tn_forward(x, gamma, beta, p, eps=1e-5, block_bytes=2 << 20,
               donate_x=False):
    """Pallas implementation of TN.forward.

    x:     [B, T, C, H, W]
    gamma: [C]  (bn.weight)
    beta:  [C]  (bn.bias)
    p:     [T]  (the module's (6,1,1,1,1) parameter, squeezed; T must match)
    block_bytes: target HBM<->VMEM tile size (~2 MiB keeps double-buffered
        in+out under the default scoped-VMEM limits on v5e/v6e/v7x while
        staying near the measured ~85% HBM-roofline plateau).
    donate_x: if the caller no longer needs x, alias the output onto the input
        HBM buffer (pass 2) to avoid allocating a second activation buffer.
    """
    B, T, C, H, W = x.shape
    assert p.shape[0] == T, "per-timestep scale p must have length T"
    N = B * T
    HW = H * W
    CHW = C * HW

    x2 = x.reshape(N, CHW)                       # lane-dense 2-D view (free)

    elt_bytes = jnp.dtype(x.dtype).itemsize
    nblk = _pick_block_rows(N, CHW * elt_bytes, T, block_bytes)
    nb = -(-N // nblk)                           # number of frame blocks

    # ---- Pass 1: lane-wise sum / sum-of-squares, 2-way parallel on v7x ------
    ncore = 2 if nb >= 2 else 1
    steps = -(-nb // ncore)
    last_blk = nb - 1
    need_mask = (nblk * nb != N) or (ncore * steps != nb)

    psum, psq = pl.pallas_call(
        partial(_stats_kernel, n_rows=N, need_mask=need_mask),
        out_shape=(jax.ShapeDtypeStruct((ncore, 1, CHW), jnp.float32),
                   jax.ShapeDtypeStruct((ncore, 1, CHW), jnp.float32)),
        grid_spec=pltpu.PrefetchScalarGridSpec(
            num_scalar_prefetch=0,
            grid=(ncore, steps),
            in_specs=[pl.BlockSpec(
                (nblk, CHW),
                lambda c, s: (jnp.minimum(c * steps + s, last_blk), 0))],
            out_specs=(pl.BlockSpec((1, 1, CHW), lambda c, s: (c, 0, 0)),
                       pl.BlockSpec((1, 1, CHW), lambda c, s: (c, 0, 0))),
        ),
        compiler_params=pltpu.CompilerParams(
            dimension_semantics=("parallel", "arbitrary")),
    )(x2)

    # ---- Tiny coefficient math in the wrapper (O(T*C + C*HW) scalars) -------
    count = jnp.float32(N * HW)
    lane_sum = jnp.sum(psum, axis=(0, 1))                     # (CHW,)
    lane_sq = jnp.sum(psq, axis=(0, 1))                       # (CHW,)
    ch_sum = lane_sum.reshape(C, HW).sum(axis=1)              # (C,)
    ch_sq = lane_sq.reshape(C, HW).sum(axis=1)                # (C,)
    mean = ch_sum / count
    # Clamp: E[x^2] - E[x]^2 can go slightly negative from f32 cancellation.
    var = jnp.maximum(ch_sq / count - mean * mean, 0.0)       # biased variance
    inv_std = lax.rsqrt(var + jnp.float32(eps))
    a_c = gamma.astype(jnp.float32) * inv_std                 # (C,)
    b_c = beta.astype(jnp.float32) - mean * a_c               # (C,)

    # Factorized coefficients: y[n, l] = (x[n, l]*a[l] + b[l]) * p[n % T].
    a_row = jnp.repeat(a_c, HW).reshape(1, CHW)               # per-lane row
    b_row = jnp.repeat(b_c, HW).reshape(1, CHW)
    # nblk % T == 0 always (single block: nblk = N = B*T; multi: lcm(8,T)|nblk),
    # so every block starts at a multiple of T and shares the same p pattern.
    pcol = jnp.tile(p.astype(jnp.float32), nblk // T).reshape(nblk, 1)

    # ---- Pass 2: fused normalize + affine + p[t] scale (parallel) -----------
    alias = {"input_output_aliases": {0: 0}} if donate_x else {}
    y2 = pl.pallas_call(
        _apply_kernel,
        out_shape=jax.ShapeDtypeStruct((N, CHW), x.dtype),
        grid_spec=pltpu.PrefetchScalarGridSpec(
            num_scalar_prefetch=0,
            grid=(nb,),
            in_specs=[
                pl.BlockSpec((nblk, CHW), lambda i: (i, 0)),
                pl.BlockSpec((nblk, 1), lambda i: (0, 0)),   # resident
                pl.BlockSpec((1, CHW), lambda i: (0, 0)),    # resident
                pl.BlockSpec((1, CHW), lambda i: (0, 0)),    # resident
            ],
            out_specs=pl.BlockSpec((nblk, CHW), lambda i: (i, 0)),
        ),
        compiler_params=pltpu.CompilerParams(
            dimension_semantics=("parallel",)),
        **alias,
    )(x2, pcol, a_row, b_row)

    return y2.reshape(B, T, C, H, W)


def _reference(x, gamma, beta, p, eps=1e-5):
    """Pure-JAX reference matching the PyTorch TN forward (training-mode BN)."""
    mean = x.mean(axis=(0, 1, 3, 4), keepdims=True)
    var = ((x - mean) ** 2).mean(axis=(0, 1, 3, 4), keepdims=True)   # biased
    y = (x - mean) / jnp.sqrt(var + eps)
    y = y * gamma.reshape(1, 1, -1, 1, 1) + beta.reshape(1, 1, -1, 1, 1)
    y = y * p.reshape(1, -1, 1, 1, 1)
    return y


# TODO(synk): the training-time update of BatchNorm running_mean/running_var
# buffers (momentum=0.1) is a side effect that does not affect the returned
# tensor and is not implemented here.

if __name__ == "__main__":
    key = jax.random.PRNGKey(0)
    kx, kg, kb, kp = jax.random.split(key, 4)

    # T = 6 is fixed by the module's p parameter of shape (6, 1, 1, 1, 1).
    B, T, C, H, W = 2, 6, 4, 16, 16
    x = jax.random.normal(kx, (B, T, C, H, W), dtype=jnp.float32)
    gamma = 1.0 + 0.1 * jax.random.normal(kg, (C,), dtype=jnp.float32)
    beta = 0.1 * jax.random.normal(kb, (C,), dtype=jnp.float32)
    p = 1.0 + 0.1 * jax.random.normal(kp, (T,), dtype=jnp.float32)

    out = jax.block_until_ready(tn_forward(x, gamma, beta, p))
    ref = _reference(x, gamma, beta, p)
    assert out.shape == (B, T, C, H, W)
    assert jnp.allclose(out, ref, atol=1e-4, rtol=1e-4), "mismatch (single block)"

    # Exercise the multi-block + masked-tail + 2-way-parallel-stats path with a
    # larger batch and a small forced block budget (N=42 frames, nblk=24).
    B2 = 7
    x_big = jax.random.normal(kx, (B2, T, C, H, W), dtype=jnp.float32)
    out_big = jax.block_until_ready(
        tn_forward(x_big, gamma, beta, p, block_bytes=24 * C * H * W * 4))
    ref_big = _reference(x_big, gamma, beta, p)
    assert jnp.allclose(out_big, ref_big, atol=1e-4, rtol=1e-4), "mismatch (multi block)"

    print("KERNEL_OK")
</pallas_src>

<mosaic_0001>
module attributes {stable_mosaic.version = 11 : i64} {
  func.func @_stats_kernel(%arg0: i32, %arg1: i32, %arg2: memref<12x1024xf32, #tpu.memory_space<vmem>>, %arg3: memref<1x1x1024xf32, #tpu.memory_space<vmem>>, %arg4: memref<1x1x1024xf32, #tpu.memory_space<vmem>>) attributes {dimension_semantics = [#tpu.dimension_semantics<parallel>, #tpu.dimension_semantics<arbitrary>], iteration_bounds = array<i64: 1, 1>, scalar_prefetch = 0 : i64, scratch_operands = 0 : i64, tpu.core_type = #tpu.core_type<tc>, window_params = [{transform_indices = @transform_0, window_bounds = array<i64: 12, 1024>}, {transform_indices = @transform_1, window_bounds = array<i64: 1, 1, 1024>}, {transform_indices = @transform_2, window_bounds = array<i64: 1, 1, 1024>}]} {
    %c0_i32 = arith.constant 0 : i32
    %0 = arith.cmpi eq, %arg1, %c0_i32 : i32
    %1 = arith.extui %0 : i1 to i32
    %c0_i32_0 = arith.constant 0 : i32
    %2 = arith.cmpi ne, %1, %c0_i32_0 : i32
    scf.if %2 {
      %cst_15 = arith.constant 0.000000e+00 : f32
      %17 = vector.broadcast %cst_15 : f32 to vector<1x1x1024xf32>
      %c0_16 = arith.constant 0 : index
      %c0_17 = arith.constant 0 : index
      %c0_18 = arith.constant 0 : index
      %18 = vector.load %arg3[%c0_16, %c0_17, %c0_18] : memref<1x1x1024xf32, #tpu.memory_space<vmem>>, vector<1x1x1024xf32>
      tpu.vector_store %arg3[%c0_16, %c0_17, %c0_18], %17 {strides = array<i32>} : memref<1x1x1024xf32, #tpu.memory_space<vmem>>, vector<1x1x1024xf32>,
      %cst_19 = arith.constant 0.000000e+00 : f32
      %19 = vector.broadcast %cst_19 : f32 to vector<1x1x1024xf32>
      %c0_20 = arith.constant 0 : index
      %c0_21 = arith.constant 0 : index
      %c0_22 = arith.constant 0 : index
      %20 = vector.load %arg4[%c0_20, %c0_21, %c0_22] : memref<1x1x1024xf32, #tpu.memory_space<vmem>>, vector<1x1x1024xf32>
      tpu.vector_store %arg4[%c0_20, %c0_21, %c0_22], %19 {strides = array<i32>} : memref<1x1x1024xf32, #tpu.memory_space<vmem>>, vector<1x1x1024xf32>,
    } else {
    }
    %c0 = arith.constant 0 : index
    %c0_1 = arith.constant 0 : index
    %3 = vector.load %arg2[%c0, %c0_1] : memref<12x1024xf32, #tpu.memory_space<vmem>>, vector<12x1024xf32>
    %c0_2 = arith.constant 0 : index
    %c0_3 = arith.constant 0 : index
    %c0_4 = arith.constant 0 : index
    %4 = vector.load %arg3[%c0_2, %c0_3, %c0_4] : memref<1x1x1024xf32, #tpu.memory_space<vmem>>, vector<1x1x1024xf32>
    %cst = arith.constant dense<0.000000e+00> : vector<1024xf32>
    %5 = vector.multi_reduction <add>, %3, %cst [0] : vector<12x1024xf32> to vector<1024xf32>
    %6 = vector.shape_cast %5 : vector<1024xf32> to vector<1x1024xf32>
    %7 = vector.shape_cast %6 : vector<1x1024xf32> to vector<1x1x1024xf32>
    %8 = arith.addf %4, %7 : vector<1x1x1024xf32>
    %c0_5 = arith.constant 0 : index
    %c0_6 = arith.constant 0 : index
    %c0_7 = arith.constant 0 : index
    %9 = vector.load %arg3[%c0_5, %c0_6, %c0_7] : memref<1x1x1024xf32, #tpu.memory_space<vmem>>, vector<1x1x1024xf32>
    tpu.vector_store %arg3[%c0_5, %c0_6, %c0_7], %8 {strides = array<i32>} : memref<1x1x1024xf32, #tpu.memory_space<vmem>>, vector<1x1x1024xf32>,
    %c0_8 = arith.constant 0 : index
    %c0_9 = arith.constant 0 : index
    %c0_10 = arith.constant 0 : index
    %10 = vector.load %arg4[%c0_8, %c0_9, %c0_10] : memref<1x1x1024xf32, #tpu.memory_space<vmem>>, vector<1x1x1024xf32>
    %11 = arith.mulf %3, %3 : vector<12x1024xf32>
    %cst_11 = arith.constant dense<0.000000e+00> : vector<1024xf32>
    %12 = vector.multi_reduction <add>, %11, %cst_11 [0] : vector<12x1024xf32> to vector<1024xf32>
    %13 = vector.shape_cast %12 : vector<1024xf32> to vector<1x1024xf32>
    %14 = vector.shape_cast %13 : vector<1x1024xf32> to vector<1x1x1024xf32>
    %15 = arith.addf %10, %14 : vector<1x1x1024xf32>
    %c0_12 = arith.constant 0 : index
    %c0_13 = arith.constant 0 : index
    %c0_14 = arith.constant 0 : index
    %16 = vector.load %arg4[%c0_12, %c0_13, %c0_14] : memref<1x1x1024xf32, #tpu.memory_space<vmem>>, vector<1x1x1024xf32>
    tpu.vector_store %arg4[%c0_12, %c0_13, %c0_14], %15 {strides = array<i32>} : memref<1x1x1024xf32, #tpu.memory_space<vmem>>, vector<1x1x1024xf32>,
    return
  }
  func.func @transform_0(%arg0: i32, %arg1: i32) -> (i32, i32) {
    %c1_i32 = arith.constant 1 : i32
    %0 = arith.muli %arg0, %c1_i32 : i32
    %1 = arith.addi %0, %arg1 : i32
    %c0_i32 = arith.constant 0 : i32
    %2 = arith.minsi %1, %c0_i32 : i32
    %c0_i32_0 = arith.constant 0 : i32
    %c0_i32_1 = arith.constant 0 : i32
    return %2, %c0_i32_0 : i32, i32
  }
  func.func @transform_1(%arg0: i32, %arg1: i32) -> (i32, i32, i32) {
    %c0_i32 = arith.constant 0 : i32
    %c0_i32_0 = arith.constant 0 : i32
    %c0_i32_1 = arith.constant 0 : i32
    return %arg0, %c0_i32, %c0_i32_0 : i32, i32, i32
  }
  func.func @transform_2(%arg0: i32, %arg1: i32) -> (i32, i32, i32) {
    %c0_i32 = arith.constant 0 : i32
    %c0_i32_0 = arith.constant 0 : i32
    %c0_i32_1 = arith.constant 0 : i32
    return %arg0, %c0_i32, %c0_i32_0 : i32, i32, i32
  }
}

</mosaic_0001>

<bundles_post_ra>
// kernel: tpu_custom_call.1
= control target key start
LH: loop header
LB: loop body
LE: loop exit
PB: predicated region body
PF: predicated region fallthrough
CT: control target
= control target key end

     0   :  { %8 = vsyncpa [#allocation3], 0  ;;  %s541_s0 = inlined_call_operand.hbm [shape: f32[12,1024], index: 0, kind: input, shape index: {}]   ;;  %s542_s1 = inlined_call_operand.hbm [shape: f32[1,1,1024], index: 1, kind: output, shape index: {0}]   ;;  %s543_s2 = inlined_call_operand.hbm [shape: f32[1,1,1024], index: 2, kind: output, shape index: {1}]  }
   0x1   :  { %9 = vsyncpa [#allocation4], 0 }
   0x2   :  { %10 = vsyncpa [#allocation7], 0  ;;  %s430_s9 = smov [#allocation2]  }
   0x3   :  { %s23_s10 = sshll.u32 %s430_s9, 4  ;;  %s24_s10 = int_to_ptr.vmem [resolvable:$true] %s23_s10 }
   0x4   :  { %s372_s11 = scalar_lea.vmem %s24_s10, 2048  ;;  %p377_p1 = scmp.lt.s32.totalorder %s24_s10, %s24_s10 }
   0x5   :  { %p373_p0 = scmp.ne.s32.totalorder %s24_s10, %s372_s11  ;;  %p378_p2 = scmp.lt.s32.totalorder %s372_s11, %s372_s11 }
   0x7   :  { %p379_p3 = por %p378_p2, %p377_p1 }
   0x9   :  { %p380_p4 = pnand %p379_p3, %p373_p0 }
   0xb   :  { %383 = shalt.err (!%p380_p4)
}
   0xc   :  { %s431_s12 = smov 1024   ;;  %s432_s13 = smov 64  }
   0xd   :  { %29 = dma.hbm_to_vmem [thread:$0]  %s541_s0, 2048, %s24_s10, [#allocation3], %s431_s12, %s431_s12, %s432_s13  }
   0xe   :  { %424 = dma.done.wait [#allocation3], 2048  }
   0xf   :  { %425 = vsyncadd [#allocation3], 4294965248  ;;  %v140_v0 = vlaneseq  ;;  %v433_v1 = vmov 1966171168   ;;  %v43_v5 = vld [vmem:[#allocation2] sm:$0xff]  ;;  %v44_v6 = vld [vmem:[#allocation2 + $0x8] sm:$0xff] }
  0x10   :  { %v138_v2 = vunpack.c.l.s4 %v433_v1  ;;  %v45_v7 = vld [vmem:[#allocation2 + $0x10] sm:$0xff]  ;;  %v46_v8 = vld [vmem:[#allocation2 + $0x18] sm:$0xff]  ;;  %v47_v9 = vld [vmem:[#allocation2 + $0x20] sm:$0xff]  ;;  %vm60_vm0 = vcmask 1043456   ;;  %v456_v15 = vmul.f32 %v43_v5, %v43_v5  ;;  %v458_v16 = vmul.f32 %v44_v6, %v44_v6  ;;  %s434_s0 = smov [#allocation5]  }
  0x11   :  { %v141_v4 = vshrl.u32 %v140_v0, 7  ;;  %v48_v10 = vld [vmem:[#allocation2 + $0x28] sm:$0xff]  ;;  %v49_v12 = vld [vmem:[#allocation2 + $0x30] sm:$0xff]  ;;  %v50_v13 = vld [vmem:[#allocation2 + $0x38] sm:$0xff]  ;;  %v460_v17 = vmul.f32 %v45_v7, %v45_v7  ;;  %v462_v18 = vmul.f32 %v46_v8, %v46_v8  ;;  %v464_v22 = vmul.f32 %v47_v9, %v47_v9  ;;  %s332_s16 = sshll.u32 %s434_s0, 4  ;;  %s333_s16 = int_to_ptr.vmem [resolvable:$true] %s332_s16 }
  0x12   :  { %v139_v3 = vunpack.c.0.s8 %v138_v2  ;;  %v51_v14 = vld [vmem:[#allocation2 + $0x40] sm:$0xf]  ;;  %v52_v19 = vld [vmem:[#allocation2 + $0x48] sm:$0xf]  ;;  %v53_v20 = vld [vmem:[#allocation2 + $0x50] sm:$0xf]  ;;  %v466_v23 = vmul.f32 %v48_v10, %v48_v10  ;;  %v468_v24 = vmul.f32 %v49_v12, %v49_v12  ;;  %v470_v25 = vmul.f32 %v50_v13, %v50_v13  ;;  %p389_p6 = scmp.lt.s32.totalorder %s333_s16, %s333_s16 }
  0x13   :  { %v54_v21 = vld [vmem:[#allocation2 + $0x58] sm:$0xf]  ;;  %v472_v26 = vmul.f32 %v51_v14, %v51_v14  ;;  %v474_v27 = vmul.f32 %v52_v19, %v52_v19  ;;  %v476_v28 = vmul.f32 %v53_v20, %v53_v20  ;;  %v480_v30 = vld [vmem:[#allocation2 + $0x60] sm:$0xf]  ;;  %v61_v31 = vsel %vm60_vm0, %v51_v14, 0.0  ;;  %s384_s17 = scalar_lea.vmem %s333_s16, 128 }
  0x14   :  { %v454_v11 = vsub.s32 %v139_v3, %v141_v4  ;;  %v478_v29 = vmul.f32 %v54_v21, %v54_v21  ;;  %v69_v32 = vsel %vm60_vm0, %v52_v19, 0.0  ;;  %v77_v33 = vsel %vm60_vm0, %v53_v20, 0.0  ;;  %v56_v35 = vld [vmem:[#allocation2 + $0x68] sm:$0xf]  ;;  %v486_v36 = vld [vmem:[#allocation2 + $0x70] sm:$0xf]  ;;  %p385_p5 = scmp.ne.s32.totalorder %s333_s16, %s384_s17  ;;  %p390_p7 = scmp.lt.s32.totalorder %s384_s17, %s384_s17 }
  0x15   :  { %v85_v34 = vsel %vm60_vm0, %v54_v21, 0.0  ;;  %v488_v37 = vld [vmem:[#allocation2 + $0x78] sm:$0xf]  ;;  %v62_v38 = vadd.f32 %v61_v31, %v43_v5  ;;  %v70_v39 = vadd.f32 %v69_v32, %v44_v6  ;;  %v78_v40 = vadd.f32 %v77_v33, %v45_v7 }
  0x16   :  { %v86_v41 = vadd.f32 %v85_v34, %v46_v8  ;;  %v93_v42 = vsel %vm60_vm0, %v480_v30, 0.0  ;;  %v101_v43 = vsel %vm60_vm0, %v56_v35, 0.0  ;;  %v109_v44 = vsel %vm60_vm0, %v486_v36, 0.0  ;;  %p391_p8 = por %p390_p7, %p389_p6 }
  0x17   :  { %v117_v45 = vsel %vm60_vm0, %v488_v37, 0.0  ;;  %v63_v46 = vrot.slane %v62_v38, 4  ;;  %v71_v47 = vrot.slane %v70_v39, 4  ;;  %v79_v48 = vrot.slane %v78_v40, 4 }
  0x18   :  { %v87_v49 = vrot.slane %v86_v41, 4  ;;  %v94_v50 = vadd.f32 %v93_v42, %v47_v9  ;;  %v102_v51 = vadd.f32 %v101_v43, %v48_v10  ;;  %v110_v52 = vadd.f32 %v109_v44, %v49_v12  ;;  %p392_p9 = pnand %p391_p8, %p385_p5 }
  0x19   :  { %v118_v53 = vadd.f32 %v117_v45, %v50_v13  ;;  %v64_v54 = vadd.f32 %v63_v46, %v62_v38  ;;  %v72_v55 = vadd.f32 %v71_v47, %v70_v39  ;;  %v80_v56 = vadd.f32 %v79_v48, %v78_v40 }
  0x1a   :  { %v88_v57 = vadd.f32 %v87_v49, %v86_v41  ;;  %v95_v58 = vrot.slane %v94_v50, 4  ;;  %v103_v59 = vrot.slane %v102_v51, 4  ;;  %v111_v60 = vrot.slane %v110_v52, 4 }
  0x1b   :  { %v119_v61 = vrot.slane %v118_v53, 4  ;;  %v65_v62 = vrot.slane %v64_v54, 2  ;;  %v73_v63 = vrot.slane %v72_v55, 2  ;;  %v81_v0 = vrot.slane %v80_v56, 2 }
  0x1c   :  { %v89_v1 = vrot.slane %v88_v57, 2  ;;  %v96_v2 = vadd.f32 %v95_v58, %v94_v50  ;;  %v104_v3 = vadd.f32 %v103_v59, %v102_v51  ;;  %v112_v4 = vadd.f32 %v111_v60, %v110_v52 }
  0x1d   :  { %v120_v5 = vadd.f32 %v119_v61, %v118_v53  ;;  %v66_v6 = vadd.f32 %v65_v62, %v64_v54  ;;  %v74_v7 = vadd.f32 %v73_v63, %v72_v55  ;;  %v82_v8 = vadd.f32 %v81_v0, %v80_v56 }
  0x1e   :  { %v90_v9 = vadd.f32 %v89_v1, %v88_v57  ;;  %v97_v10 = vrot.slane %v96_v2, 2  ;;  %v105_v12 = vrot.slane %v104_v3, 2  ;;  %v113_v13 = vrot.slane %v112_v4, 2 }
  0x1f   :  { %v121_v14 = vrot.slane %v120_v5, 2  ;;  %v67_v19 = vrot.slane %v66_v6, 1  ;;  %v75_v20 = vrot.slane %v74_v7, 1  ;;  %v83_v21 = vrot.slane %v82_v8, 1 }
  0x20   :  { %v91_v31 = vrot.slane %v90_v9, 1  ;;  %v98_v32 = vadd.f32 %v97_v10, %v96_v2  ;;  %v106_v33 = vadd.f32 %v105_v12, %v104_v3  ;;  %v114_v34 = vadd.f32 %v113_v13, %v112_v4 }
  0x21   :  { %v122_v38 = vadd.f32 %v121_v14, %v120_v5  ;;  %v68_v39 = vadd.f32 %v67_v19, %v66_v6  ;;  %v76_v40 = vadd.f32 %v75_v20, %v74_v7  ;;  %v84_v41 = vadd.f32 %v83_v21, %v82_v8 }
  0x22   :  { %v92_v42 = vadd.f32 %v91_v31, %v90_v9  ;;  %v99_v43 = vrot.slane %v98_v32, 1  ;;  %v107_v44 = vrot.slane %v106_v33, 1  ;;  %v115_v45 = vrot.slane %v114_v34, 1 }
  0x23   :  { %v123_v46 = vrot.slane %v122_v38, 1  ;;  %v133_v47 = vcombine.low %v68_v39, %v76_v40  ;;  %v198_v49 = vmul.f32 %v480_v30, %v480_v30  ;;  %v199_v50 = vmul.f32 %v56_v35, %v56_v35 }
  0x24   :  { %v134_v48 = vcombine.low %v84_v41, %v92_v42  ;;  %v100_v51 = vadd.f32 %v99_v43, %v98_v32  ;;  %v108_v52 = vadd.f32 %v107_v44, %v106_v33  ;;  %v116_v53 = vadd.f32 %v115_v45, %v114_v34 }
  0x25   :  { %v124_v54 = vadd.f32 %v123_v46, %v122_v38  ;;  %v143_v55 = vrot.slane %v133_v47, %v454_v11  ;;  %v200_v57 = vmul.f32 %v486_v36, %v486_v36  ;;  %v201_v58 = vmul.f32 %v488_v37, %v488_v37 }
  0x26   :  { %v150_v56 = vrot.slane %v134_v48, %v454_v11  ;;  %v135_v59 = vcombine.low %v100_v51, %v108_v52  ;;  %v202_v30 = vsel %vm60_vm0, %v472_v26, 0.0  ;;  %v210_v35 = vsel %vm60_vm0, %v474_v27, 0.0 }
  0x27   :  { %v136_v60 = vcombine.low %v116_v53, %v124_v54  ;;  %v203_v62 = vadd.f32 %v202_v30, %v456_v15  ;;  %v211_v63 = vadd.f32 %v210_v35, %v458_v16  ;;  %v218_v0 = vsel %vm60_vm0, %v476_v28, 0.0 }
  0x28   :  { %v165_v61 = vcombine.low %v143_v55, %v150_v56  ;;  %v157_v36 = vrot.slane %v135_v59, %v454_v11  ;;  %v219_v1 = vadd.f32 %v218_v0, %v460_v17  ;;  %v226_v26 = vsel %vm60_vm0, %v478_v29, 0.0 }
  0x29   :  { %v164_v37 = vrot.slane %v136_v60, %v454_v11  ;;  %v204_v27 = vrot.slane %v203_v62, 4  ;;  %v212_v3 = vrot.slane %v211_v63, 4  ;;  %v227_v15 = vadd.f32 %v226_v26, %v462_v18 }
  0x2a   :  { %v173_v2 = vrot.slane %v165_v61, %v454_v11  ;;  %v220_v16 = vrot.slane %v219_v1, 4  ;;  %v234_v5 = vsel %vm60_vm0, %v198_v49, 0.0  ;;  %v242_v28 = vsel %vm60_vm0, %v199_v50, 0.0 }
  0x2b   :  { %v166_v4 = vcombine.low %v157_v36, %v164_v37  ;;  %v205_v6 = vadd.f32 %v204_v27, %v203_v62  ;;  %v213_v7 = vadd.f32 %v212_v3, %v211_v63  ;;  %v228_v8 = vrot.slane %v227_v15, 4 }
  0x2c   :  { %v235_v17 = vadd.f32 %v234_v5, %v464_v22  ;;  %v221_v29 = vadd.f32 %v220_v16, %v219_v1  ;;  %v243_v10 = vadd.f32 %v242_v28, %v466_v23  ;;  %v250_v12 = vsel %vm60_vm0, %v200_v57, 0.0 }
  0x2d   :  { %v180_v9 = vrot.slane %v166_v4, %v454_v11  ;;  %v206_v13 = vrot.slane %v205_v6, 2  ;;  %v214_v18 = vrot.slane %v213_v7, 2  ;;  %v229_v14 = vadd.f32 %v228_v8, %v227_v15 }
  0x2e   :  { %v236_v19 = vrot.slane %v235_v17, 4  ;;  %v222_v21 = vrot.slane %v221_v29, 2  ;;  %v244_v31 = vrot.slane %v243_v10, 4  ;;  %v251_v32 = vadd.f32 %v250_v12, %v468_v24 }
  0x2f   :  { %v181_v20 = vcombine.low %v173_v2, %v180_v9  ;;  %v207_v33 = vadd.f32 %v206_v13, %v205_v6  ;;  %v215_v22 = vadd.f32 %v214_v18, %v213_v7  ;;  %v230_v34 = vrot.slane %v229_v14, 2 }
  0x30   :  { %v237_v38 = vadd.f32 %v236_v19, %v235_v17  ;;  %v223_v39 = vadd.f32 %v222_v21, %v221_v29  ;;  %v245_v40 = vadd.f32 %v244_v31, %v243_v10  ;;  %v252_v23 = vrot.slane %v251_v32, 4 }
  0x31   :  { %v208_v41 = vrot.slane %v207_v33, 1  ;;  %v216_v42 = vrot.slane %v215_v22, 1  ;;  %v231_v43 = vadd.f32 %v230_v34, %v229_v14  ;;  %184 = vst [vmem:[#allocation5] sm:$0xff] %v181_v20  ;;  %v258_v48 = vsel %vm60_vm0, %v201_v58, 0.0 }
  0x32   :  { %v238_v44 = vrot.slane %v237_v38, 2  ;;  %v224_v45 = vrot.slane %v223_v39, 1  ;;  %v246_v46 = vrot.slane %v245_v40, 2  ;;  %v253_v47 = vadd.f32 %v252_v23, %v251_v32 }
  0x33   :  { %v232_v49 = vrot.slane %v231_v43, 1 }
  0x34   :  { %v239_v24 = vadd.f32 %v238_v44, %v237_v38 }
  0x35   :  { %395 = shalt.err (!%p392_p9)
}
  0x36   :  { %335 = dma.vmem_to_hbm [thread:$0]  %s333_s16, 128, %s542_s1, [#allocation4]   ;;  %v247_v50 = vadd.f32 %v246_v46, %v245_v40  ;;  %v254_v51 = vrot.slane %v253_v47, 2  ;;  %v259_v52 = vadd.f32 %v258_v48, %v470_v25  ;;  %v209_v53 = vadd.f32 %v208_v41, %v207_v33 }
  0x37   :  { %v217_v54 = vadd.f32 %v216_v42, %v215_v22  ;;  %v225_v55 = vadd.f32 %v224_v45, %v223_v39  ;;  %v240_v56 = vrot.slane %v239_v24, 1  ;;  %v233_v57 = vadd.f32 %v232_v49, %v231_v43  ;;  %s435_s1 = smov [#allocation6]  }
  0x38   :  { %v248_v58 = vrot.slane %v247_v50, 1  ;;  %v255_v59 = vadd.f32 %v254_v51, %v253_v47  ;;  %v260_v60 = vrot.slane %v259_v52, 4  ;;  %s342_s20 = sshll.u32 %s435_s1, 4  ;;  %s343_s20 = int_to_ptr.vmem [resolvable:$true] %s342_s20 }
  0x39   :  { %v241_v35 = vadd.f32 %v240_v56, %v239_v24  ;;  %v274_v61 = vcombine.low %v209_v53, %v217_v54  ;;  %v275_v36 = vcombine.low %v225_v55, %v233_v57  ;;  %s404_s21 = scalar_lea.vmem %s343_s20, 128  ;;  %p409_p11 = scmp.lt.s32.totalorder %s343_s20, %s343_s20 }
  0x3a   :  { %v261_v30 = vadd.f32 %v260_v60, %v259_v52  ;;  %v249_v62 = vadd.f32 %v248_v58, %v247_v50  ;;  %v256_v63 = vrot.slane %v255_v59, 1  ;;  %p405_p10 = scmp.ne.s32.totalorder %s343_s20, %s404_s21  ;;  %p410_p12 = scmp.lt.s32.totalorder %s404_s21, %s404_s21 }
  0x3b   :  { %v284_v1 = vrot.slane %v274_v61, %v454_v11  ;;  %v291_v27 = vrot.slane %v275_v36, %v454_v11 }
  0x3c   :  { %v262_v0 = vrot.slane %v261_v30, 2  ;;  %v257_v26 = vadd.f32 %v256_v63, %v255_v59  ;;  %v276_v2 = vcombine.low %v241_v35, %v249_v62  ;;  %p411_p13 = por %p410_p12, %p409_p11 }
  0x3d   :  { %v306_v16 = vcombine.low %v284_v1, %v291_v27 }
  0x3e   :  { %v263_v37 = vadd.f32 %v262_v0, %v261_v30  ;;  %v298_v4 = vrot.slane %v276_v2, %v454_v11  ;;  %p412_p0 = pnand %p411_p13, %p405_p10 }
  0x3f   :  { %v314_v6 = vrot.slane %v306_v16, %v454_v11 }
  0x40   :  { %v264_v25 = vrot.slane %v263_v37, 1 }
  0x42   :  { %v265_v3 = vadd.f32 %v264_v25, %v263_v37 }
  0x44   :  { %v277_v15 = vcombine.low %v257_v26, %v265_v3 }
  0x46   :  { %v305_v5 = vrot.slane %v277_v15, %v454_v11 }
  0x48   :  { %v307_v28 = vcombine.low %v298_v4, %v305_v5 }
  0x4a   :  { %v321_v7 = vrot.slane %v307_v28, %v454_v11 }
  0x4c   :  { %v322_v8 = vcombine.low %v314_v6, %v321_v7 }
  0x4e   :  { %325 = vst [vmem:[#allocation6] sm:$0xff] %v322_v8 }
  0x4f   :  { %415 = shalt.err (!%p412_p0)
}
  0x50   :  { %345 = dma.vmem_to_hbm [thread:$0]  %s343_s20, 128, %s543_s2, [#allocation7]  }
  0x51   :  { %426 = dma.done.wait [#allocation4], 128  }
  0x52   :  { %427 = vsyncadd [#allocation4], 4294967168 }
  0x53   :  { %428 = dma.done.wait [#allocation7], 128  }
  0x54   :  { %429 = vsyncadd [#allocation7], 4294967168 }
  0x55   :  { %352 = vsyncpa [#allocation3], 1 }
  0x56   :  { %353 = vsyncpa [#allocation4], 1 }
  0x57   :  { %354 = vsyncpa [#allocation7], 1 }

</bundles_post_ra>
